<compile_context>
chip_gen: v7x
topology: tpu7x:2x2x1
jax: 0.10.0
libtpu: 0.0.40
codegen_flags: <defaults>
</compile_context>

<pallas_src>
import functools

import jax
import jax.numpy as jnp
from jax.experimental import pallas as pl
from jax.experimental.pallas import tpu as pltpu

# ---- model config (from the PyTorch module) --------------------------------
IN_CHANNELS = 1
HIDDEN_CHANNELS = 16
OUT_CHANNELS = 2
N_NODES = 34          # karate-club-sized graph

# padded sizes: node dim -> 64 sublanes, feature dim -> 128 lanes
N_PAD = 64
F_PAD = 128


def _pad2(x, rows, cols):
    r, c = x.shape
    return jnp.pad(x, ((0, rows - r), (0, cols - c)))


# ---- Pallas kernel: GCN forward on resident VMEM tiles ----------------------
def gcn_kernel(a_ref, h0_ref, b_ref, w2_ref, out_ref, *, out_ch):
    a = a_ref[...]                                   # [N_PAD, N_PAD]  bf16
    b1 = b_ref[0:1, :]                               # [1, F_PAD]      f32
    b2 = b_ref[1:2, :]                               # [1, F_PAD]      f32

    # ---- layer 1: relu(A_norm @ (X @ W1) + b1)  (bf16 MXU, f32 accumulate) ----
    h = jnp.dot(a, h0_ref[...], preferred_element_type=jnp.float32) + b1
    h = jnp.maximum(h, 0.0)                          # relu in f32

    # dropout(p=0.5): eval-mode semantics -> identity
    # TODO(synk): training-mode dropout would need pltpu.prng_seed/prng_random_bits.

    # ---- layer 2: A_norm @ H @ W2 + b2 ----
    z = jnp.dot(h.astype(jnp.bfloat16), w2_ref[...],
                preferred_element_type=jnp.float32)
    z = jnp.dot(a, z.astype(jnp.bfloat16),
                preferred_element_type=jnp.float32) + b2

    # ---- log_softmax over dim=1, masking padded feature columns (once) ----
    col = jax.lax.broadcasted_iota(jnp.int32, z.shape, 1)
    z_masked = jnp.where(col < out_ch, z, -1e30)
    m = jnp.max(z_masked, axis=1, keepdims=True)
    e = jnp.exp(z_masked - m)                        # padded lanes -> exp(-huge) = 0
    lse = m + jnp.log(jnp.sum(e, axis=1, keepdims=True))
    # padded lanes/rows are never read by the wrapper slice -> no final select.
    out_ref[...] = z - lse


def make_gcn_forward(a_norm, w1, b1, w2, b2):
    """Prepares padded/cast parameters once and returns a jitted forward(x)."""
    n = a_norm.shape[0]

    # parameter-only prep, done once (pad + bf16 cast fuse into one XLA op each)
    a_p = _pad2(a_norm.astype(jnp.float32), N_PAD, N_PAD).astype(jnp.bfloat16)
    w2_p = _pad2(w2.astype(jnp.float32), F_PAD, F_PAD).astype(jnp.bfloat16)
    b_p = jnp.stack([
        jnp.pad(b1.astype(jnp.float32), (0, F_PAD - b1.shape[0])),
        jnp.pad(b2.astype(jnp.float32), (0, F_PAD - b2.shape[0])),
    ], axis=0)                                                  # [2, F_PAD] f32
    w1_f = w1.astype(jnp.float32)

    cost = pl.CostEstimate(flops=4_200_000, bytes_accessed=180_000,
                           transcendentals=8192)

    kernel_call = pl.pallas_call(
        functools.partial(gcn_kernel, out_ch=OUT_CHANNELS),
        out_shape=jax.ShapeDtypeStruct((N_PAD, F_PAD), jnp.float32),
        in_specs=[pl.BlockSpec(memory_space=pltpu.MemorySpace.VMEM)] * 4,
        out_specs=pl.BlockSpec(memory_space=pltpu.MemorySpace.VMEM),
        cost_estimate=cost,
    )

    @jax.jit
    def forward(x):
        # precompute X @ W1 outside the kernel ([34,1]@[1,16] — trivial for XLA)
        h0 = x.astype(jnp.float32) @ w1_f                      # [N, HIDDEN]
        h0_p = _pad2(h0, N_PAD, F_PAD).astype(jnp.bfloat16)    # pad+cast fuse
        out_p = kernel_call(a_p, h0_p, b_p, w2_p)
        return out_p[:n, :OUT_CHANNELS]

    return forward


# ---- glue: GCN normalization (A_hat = A + I, D^-1/2 A_hat D^-1/2) -----------
def build_normalized_adjacency(edge_index, num_nodes):
    src, dst = edge_index[0], edge_index[1]
    a = jnp.zeros((num_nodes, num_nodes), jnp.float32)
    a = a.at[src, dst].set(1.0)
    a = jnp.maximum(a, a.T)                          # symmetrize (undirected)
    a = a + jnp.eye(num_nodes, dtype=jnp.float32)    # add self loops
    deg = jnp.sum(a, axis=1)
    d_inv_sqrt = jnp.where(deg > 0, 1.0 / jnp.sqrt(deg), 0.0)
    return d_inv_sqrt[:, None] * a * d_inv_sqrt[None, :]


if __name__ == "__main__":
    key = jax.random.PRNGKey(0)
    k_x, k_e, k_w1, k_w2 = jax.random.split(key, 4)

    # deterministic synthetic graph (karate-club-sized: 34 nodes, ~78 edges)
    num_edges = 78
    src = jax.random.randint(k_e, (num_edges,), 0, N_NODES)
    dst = jax.random.randint(jax.random.fold_in(k_e, 1), (num_edges,), 0, N_NODES)
    edge_index = jnp.stack([src, dst], axis=0)                 # [2, E] int32

    # node features [N, in_channels]
    x = jax.random.normal(k_x, (N_NODES, IN_CHANNELS), jnp.float32)

    # deterministic parameter init (glorot-ish weights, zero biases — GCNConv defaults)
    w1 = jax.random.normal(k_w1, (IN_CHANNELS, HIDDEN_CHANNELS), jnp.float32) * (
        1.0 / jnp.sqrt(jnp.float32(IN_CHANNELS)))
    b1 = jnp.zeros((HIDDEN_CHANNELS,), jnp.float32)
    w2 = jax.random.normal(k_w2, (HIDDEN_CHANNELS, OUT_CHANNELS), jnp.float32) * (
        1.0 / jnp.sqrt(jnp.float32(HIDDEN_CHANNELS)))
    b2 = jnp.zeros((OUT_CHANNELS,), jnp.float32)

    a_norm = build_normalized_adjacency(edge_index, N_NODES)

    gcn_forward = make_gcn_forward(a_norm, w1, b1, w2, b2)
    out = gcn_forward(x)
    out = jax.block_until_ready(out)

    # sanity: log_softmax rows should exp-sum to 1
    row_sums = jnp.sum(jnp.exp(out), axis=1)
    assert out.shape == (N_NODES, OUT_CHANNELS)
    assert bool(jnp.all(jnp.abs(row_sums - 1.0) < 1e-3))

    # cross-check against a pure-JAX f32 reference (bf16 matmul tolerance)
    h_ref = jnp.maximum(a_norm @ (x @ w1) + b1[None, :], 0.0)
    z_ref = a_norm @ (h_ref @ w2) + b2[None, :]
    ref = jax.nn.log_softmax(z_ref, axis=1)
    assert bool(jnp.all(jnp.abs(out - ref) < 3e-2))

    print("KERNEL_OK")
</pallas_src>

<mosaic_0001>
module attributes {stable_mosaic.version = 11 : i64} {
  func.func @gcn_kernel(%arg0: memref<64x64xbf16, #tpu.memory_space<vmem>>, %arg1: memref<64x128xbf16, #tpu.memory_space<vmem>>, %arg2: memref<2x128xf32, #tpu.memory_space<vmem>>, %arg3: memref<128x128xbf16, #tpu.memory_space<vmem>>, %arg4: memref<64x128xf32, #tpu.memory_space<vmem>>) attributes {dimension_semantics = [], scalar_prefetch = 0 : i64, scratch_operands = 0 : i64, tpu.core_type = #tpu.core_type<tc>} {
    %c0 = arith.constant 0 : index
    %c0_0 = arith.constant 0 : index
    %0 = vector.load %arg0[%c0, %c0_0] : memref<64x64xbf16, #tpu.memory_space<vmem>>, vector<64x64xbf16>
    %c0_1 = arith.constant 0 : index
    %c0_2 = arith.constant 0 : index
    %1 = vector.load %arg2[%c0_1, %c0_2] : memref<2x128xf32, #tpu.memory_space<vmem>>, vector<1x128xf32>
    %c1 = arith.constant 1 : index
    %c0_3 = arith.constant 0 : index
    %2 = vector.load %arg2[%c1, %c0_3] : memref<2x128xf32, #tpu.memory_space<vmem>>, vector<1x128xf32>
    %c0_4 = arith.constant 0 : index
    %c0_5 = arith.constant 0 : index
    %3 = vector.load %arg1[%c0_4, %c0_5] : memref<64x128xbf16, #tpu.memory_space<vmem>>, vector<64x128xbf16>
    %cst = arith.constant dense<0.000000e+00> : vector<64x128xf32>
    %4 = tpu.matmul %0, %3, %cst {dimension_numbers = #tpu.dot_dimension_numbers<[1], [0], [0], [1], [0, 0, 1, 1], [], []>} : vector<64x64xbf16>, vector<64x128xbf16>, vector<64x128xf32> -> vector<64x128xf32>
    %5 = vector.broadcast %1 : vector<1x128xf32> to vector<64x128xf32>
    %6 = arith.addf %4, %5 : vector<64x128xf32>
    %cst_6 = arith.constant 0.000000e+00 : f32
    %7 = vector.broadcast %cst_6 : f32 to vector<64x128xf32>
    %8 = arith.maximumf %6, %7 : vector<64x128xf32>
    %9 = arith.truncf %8 : vector<64x128xf32> to vector<64x128xbf16>
    %c0_7 = arith.constant 0 : index
    %c0_8 = arith.constant 0 : index
    %10 = vector.load %arg3[%c0_7, %c0_8] : memref<128x128xbf16, #tpu.memory_space<vmem>>, vector<128x128xbf16>
    %cst_9 = arith.constant dense<0.000000e+00> : vector<64x128xf32>
    %11 = tpu.matmul %9, %10, %cst_9 {dimension_numbers = #tpu.dot_dimension_numbers<[1], [0], [0], [1], [0, 0, 1, 1], [], []>} : vector<64x128xbf16>, vector<128x128xbf16>, vector<64x128xf32> -> vector<64x128xf32>
    %12 = arith.truncf %11 : vector<64x128xf32> to vector<64x128xbf16>
    %cst_10 = arith.constant dense<0.000000e+00> : vector<64x128xf32>
    %13 = tpu.matmul %0, %12, %cst_10 {dimension_numbers = #tpu.dot_dimension_numbers<[1], [0], [0], [1], [0, 0, 1, 1], [], []>} : vector<64x64xbf16>, vector<64x128xbf16>, vector<64x128xf32> -> vector<64x128xf32>
    %14 = vector.broadcast %2 : vector<1x128xf32> to vector<64x128xf32>
    %15 = arith.addf %13, %14 : vector<64x128xf32>
    %16 = tpu.iota {dimensions = array<i32: 1>} : vector<64x128xi32>
    %c2_i32 = arith.constant 2 : i32
    %17 = vector.broadcast %c2_i32 : i32 to vector<64x128xi32>
    %18 = arith.cmpi slt, %16, %17 : vector<64x128xi32>
    %cst_11 = arith.constant -1.000000e+30 : f32
    %19 = vector.broadcast %cst_11 : f32 to vector<64x128xf32>
    %20 = arith.select %18, %15, %19 : vector<64x128xi1>, vector<64x128xf32>
    %cst_12 = arith.constant dense<0xFF800000> : vector<64xf32>
    %21 = vector.multi_reduction <maximumf>, %20, %cst_12 [1] : vector<64x128xf32> to vector<64xf32>
    %22 = vector.shape_cast %21 : vector<64xf32> to vector<64x1xf32>
    %23 = vector.broadcast %22 : vector<64x1xf32> to vector<64x128xf32>
    %24 = arith.subf %20, %23 : vector<64x128xf32>
    %25 = math.exp %24 : vector<64x128xf32>
    %cst_13 = arith.constant dense<0.000000e+00> : vector<64xf32>
    %26 = vector.multi_reduction <add>, %25, %cst_13 [1] : vector<64x128xf32> to vector<64xf32>
    %27 = vector.shape_cast %26 : vector<64xf32> to vector<64x1xf32>
    %28 = math.log %27 : vector<64x1xf32>
    %29 = arith.addf %22, %28 : vector<64x1xf32>
    %30 = vector.broadcast %29 : vector<64x1xf32> to vector<64x128xf32>
    %31 = arith.subf %15, %30 : vector<64x128xf32>
    %c0_14 = arith.constant 0 : index
    %c0_15 = arith.constant 0 : index
    %32 = vector.load %arg4[%c0_14, %c0_15] : memref<64x128xf32, #tpu.memory_space<vmem>>, vector<64x128xf32>
    tpu.vector_store %arg4[%c0_14, %c0_15], %31 {strides = array<i32>} : memref<64x128xf32, #tpu.memory_space<vmem>>, vector<64x128xf32>,
    return
  }
}

</mosaic_0001>

<bundles_post_ra>
// kernel: forward.1
= control target key start
LH: loop header
LB: loop body
LE: loop exit
PB: predicated region body
PF: predicated region fallthrough
CT: control target
= control target key end

     0   :  { %vm84_vm0 = vcmask 523264   ;;  %v376_v57 = vlaneseq  ;;  %s840_s1 = inlined_call_operand.vmem [shape: bf16[64,128], index: 1, kind: input, shape index: {}]   ;;  %s841_s0 = inlined_call_operand.vmem [shape: bf16[64,64], index: 0, kind: input, shape index: {}]   ;;  %s842_s3 = inlined_call_operand.vmem [shape: bf16[128,128], index: 3, kind: input, shape index: {}]   ;;  %s843_s2 = inlined_call_operand.vmem [shape: f32[2,128], index: 2, kind: input, shape index: {}]   ;;  %s844_s4 = inlined_call_operand.vmem [shape: f32[64,128], index: 4, kind: output, shape index: {}]  }
   0x1   :  { %v597_v0 = vld [vmem:[%s840_s1] sm:$0xff]   ;;  %v598_v1 = vld [vmem:[%s840_s1 + $0x8] sm:$0xff]   ;;  %v599_v2 = vld [vmem:[%s840_s1 + $0x10] sm:$0xff]  }
   0x2   :  { %541 = vmatprep.subr.bf16.mxu0 %v597_v0  ;;  %v601_v3 = vld [vmem:[%s841_s0] sm:$0xff]   ;;  %v600_v4 = vld [vmem:[%s840_s1 + $0x18] sm:$0xff]   ;;  %v606_v6 = vld [vmem:[%s842_s3 + $0x8] sm:$0xff]   ;;  %v377_v58 = vand.u32 127, %v376_v57 }
   0x3   :  { %542 = vmatpush3.bf16.msra.mxu0 %v597_v0  ;;  %549 = vmatprep.mubr.msk.bf16.mxu0 %vm84_vm0, %v601_v3  ;;  %v605_v5 = vld [vmem:[%s842_s3] sm:$0xff]   ;;  %v607_v7 = vld [vmem:[%s842_s3 + $0x10] sm:$0xff]   ;;  %v698_v8 = vld [vmem:[%s841_s0 + $0x8] sm:$0xff]  }
   0x4   :  { %543 = vmatprep.subr.bf16.mxu0 %v598_v1  ;;  %557 = vmatprep.subr.bf16.mxu1 %v605_v5  ;;  %v703_v9 = vld [vmem:[%s841_s0 + $0x10] sm:$0xff]   ;;  %v608_v10 = vld [vmem:[%s842_s3 + $0x18] sm:$0xff]   ;;  %v609_v11 = vld [vmem:[%s842_s3 + $0x20] sm:$0xff]   ;;  %vm378_vm1 = vcmp.lt.s32.totalorder %v377_v58, 2 }
   0x5   :  { %558 = vmatpush3.bf16.msra.mxu1 %v605_v5  ;;  %v718_v12 = vld [vmem:[%s841_s0 + $0x18] sm:$0xff]   ;;  %v610_v13 = vld [vmem:[%s842_s3 + $0x28] sm:$0xff]   ;;  %v611_v14 = vld [vmem:[%s842_s3 + $0x30] sm:$0xff]  }
   0x6   :  { %559 = vmatprep.subr.bf16.mxu1 %v606_v6  ;;  %v612_v15 = vld [vmem:[%s842_s3 + $0x38] sm:$0xff]   ;;  %v487_v16 = vld [vmem:[%s843_s2] ss:$0 sm:$0xff]  ;;  %v508_v59 = vld [vmem:[%s843_s2 + $0x1] ss:$0 sm:$0xff] }
   0x7   :  { %544 = vmatpush3.bf16.msra.mxu0 %v598_v1 }
   0x8   :  { %545 = vmatprep.subr.bf16.mxu0 %v599_v2 }
   0x9   :  { %560 = vmatpush3.bf16.msra.mxu1 %v606_v6 }
   0xa   :  { %561 = vmatprep.subr.bf16.mxu1 %v607_v7 }
   0xb   :  { %546 = vmatpush3.bf16.msra.mxu0 %v599_v2 }
   0xc   :  { %547 = vmatprep.subr.bf16.mxu0 %v600_v4 }
   0xd   :  { %562 = vmatpush3.bf16.msra.mxu1 %v607_v7 }
   0xe   :  { %563 = vmatprep.subr.bf16.mxu1 %v608_v10 }
   0xf   :  { %548 = vmatpush3.bf16.msra.mxu0 %v600_v4 }
  0x11   :  { %564 = vmatpush3.bf16.msra.mxu1 %v608_v10 }
  0x12   :  { %550 = vmatmul.mubr.msk.bf16.vlgmr.msra.gmra.mrb[0].mxu0 %vm84_vm0, %v698_v8  ;;  %565 = vmatprep.subr.bf16.mxu1 %v609_v11 }
  0x13   :  { %553 = vmatprep.mubr.msk.bf16.mxu0 %vm84_vm0, %v703_v9 }
  0x15   :  { %566 = vmatpush3.bf16.msra.mxu1 %v609_v11 }
  0x16   :  { %567 = vmatprep.subr.bf16.mxu1 %v610_v13 }
  0x19   :  { %568 = vmatpush3.bf16.msra.mxu1 %v610_v13 }
  0x1a   :  { %554 = vmatmul.mubr.msk.bf16.gmra.mrb[4].mxu0 %vm84_vm0, %v718_v12  ;;  %569 = vmatprep.subr.bf16.mxu1 %v611_v14 }
  0x1b   :  { %589 = vmatprep.mubr.msk.bf16.mxu0 %vm84_vm0, %v601_v3 }
  0x1d   :  { %570 = vmatpush3.bf16.msra.mxu1 %v611_v14 }
  0x1e   :  { %571 = vmatprep.subr.bf16.mxu1 %v612_v15 }
  0x21   :  { %572 = vmatpush3.bf16.msra.mxu1 %v612_v15 }
  0xe5   :  { %v551_v17 = vpop.f32.mrb[0].mxu0 }
  0xe6   :  { %v140_v18 = vadd.f32 %v551_v17, %v487_v16  ;;  %v131_v19 = vpop.f32.mrb[1].mxu0 }
  0xe7   :  { %v132_v20 = vadd.f32 %v487_v16, %v131_v19  ;;  %v552_v21 = vpop.f32.mrb[2].mxu0 }
  0xe8   :  { %v143_v22 = vadd.f32 %v552_v21, %v487_v16  ;;  %v134_v23 = vpop.f32.mrb[3].mxu0  ;;  %v164_v25 = vmax.f32 %v140_v18, 0.0 }
  0xe9   :  { %v135_v24 = vadd.f32 %v487_v16, %v134_v23  ;;  %v162_v27 = vmax.f32 %v132_v20, 0.0 }
  0xea   :  { %v165_v26 = vmax.f32 %v143_v22, 0.0 }
  0xeb   :  { %v163_v28 = vmax.f32 %v135_v24, 0.0 }
  0xec   :  { %v171_v29 = vpack.c.bf16 %v165_v26, %v164_v25 }
  0xed   :  { %v555_v30 = vpop.f32.mrb[4].mxu0  ;;  %v170_v31 = vpack.c.bf16 %v163_v28, %v162_v27 }
  0xee   :  { %v156_v32 = vadd.f32 %v555_v30, %v487_v16  ;;  %v147_v33 = vpop.f32.mrb[5].mxu0 }
  0xef   :  { %v148_v34 = vadd.f32 %v487_v16, %v147_v33  ;;  %v556_v35 = vpop.f32.mrb[6].mxu0  ;;  %573 = vmatprep.mubr.bf16.mxu1 %v170_v31 }
  0xf0   :  { %v159_v36 = vadd.f32 %v556_v35, %v487_v16  ;;  %v150_v37 = vpop.f32.mrb[7].mxu0  ;;  %574 = vmatmul.mubr.bf16.vlgmr.msra.gmra.mrb[0].mxu1 %v171_v29  ;;  %v168_v39 = vmax.f32 %v156_v32, 0.0 }
  0xf1   :  { %v151_v38 = vadd.f32 %v487_v16, %v150_v37  ;;  %v166_v41 = vmax.f32 %v148_v34, 0.0 }
  0xf2   :  { %v169_v40 = vmax.f32 %v159_v36, 0.0 }
  0xf3   :  { %v167_v42 = vmax.f32 %v151_v38, 0.0 }
  0xf4   :  { %v173_v43 = vpack.c.bf16 %v169_v40, %v168_v39 }
  0xf5   :  { %v172_v44 = vpack.c.bf16 %v167_v42, %v166_v41 }
  0xf7   :  { %577 = vmatprep.mubr.bf16.mxu1 %v172_v44 }
  0xf8   :  { %578 = vmatmul.mubr.bf16.gmra.mrb[4].mxu1 %v173_v43 }
 0x1c3   :  { %v575_v45 = vpop.f32.mrb[0].mxu1 }
 0x1c4   :  { %v272_v46 = vpop.f32.mrb[1].mxu1 }
 0x1c5   :  { %v576_v47 = vpop.f32.mrb[2].mxu1 }
 0x1c6   :  { %v304_v48 = vpack.c.bf16 %v576_v47, %v575_v45  ;;  %v275_v49 = vpop.f32.mrb[3].mxu1 }
 0x1c7   :  { %v303_v50 = vpack.c.bf16 %v275_v49, %v272_v46 }
 0x1c9   :  { %581 = vmatprep.subr.bf16.mxu0 %v303_v50 }
 0x1ca   :  { %582 = vmatpush3.bf16.msra.mxu0 %v303_v50 }
 0x1cb   :  { %v579_v51 = vpop.f32.mrb[4].mxu1  ;;  %583 = vmatprep.subr.bf16.mxu0 %v304_v48 }
 0x1cc   :  { %v288_v52 = vpop.f32.mrb[5].mxu1 }
 0x1cd   :  { %v580_v53 = vpop.f32.mrb[6].mxu1 }
 0x1ce   :  { %v306_v54 = vpack.c.bf16 %v580_v53, %v579_v51  ;;  %v291_v55 = vpop.f32.mrb[7].mxu1  ;;  %584 = vmatpush3.bf16.msra.mxu0 %v304_v48 }
 0x1cf   :  { %v305_v56 = vpack.c.bf16 %v291_v55, %v288_v52 }
 0x1d1   :  { %585 = vmatprep.subr.bf16.mxu0 %v305_v56 }
 0x1d2   :  { %586 = vmatpush3.bf16.msra.mxu0 %v305_v56 }
 0x1d3   :  { %587 = vmatprep.subr.bf16.mxu0 %v306_v54 }
 0x1d6   :  { %588 = vmatpush3.bf16.msra.mxu0 %v306_v54 }
 0x1d9   :  { %590 = vmatmul.mubr.msk.bf16.vlgmr.msra.gmra.mrb[8].mxu0 %vm84_vm0, %v698_v8 }
 0x1da   :  { %593 = vmatprep.mubr.msk.bf16.mxu0 %vm84_vm0, %v703_v9 }
 0x1e1   :  { %594 = vmatmul.mubr.msk.bf16.gmra.mrb[12].mxu0 %vm84_vm0, %v718_v12 }
 0x2ac   :  { %v591_v60 = vpop.f32.mrb[8].mxu0 }
 0x2ad   :  { %v744_v61 = vadd.f32 %v591_v60, %v508_v59  ;;  %v345_v62 = vpop.f32.mrb[9].mxu0 }
 0x2ae   :  { %v746_v63 = vadd.f32 %v508_v59, %v345_v62  ;;  %v592_v0 = vpop.f32.mrb[10].mxu0 }
 0x2af   :  { %v748_v1 = vadd.f32 %v592_v0, %v508_v59  ;;  %v348_v2 = vpop.f32.mrb[11].mxu0  ;;  %v381_v3 = vsel %vm378_vm1, %v744_v61, -1e+30 }
 0x2b0   :  { %v752_v4 = vadd.f32 %v508_v59, %v348_v2  ;;  %391 = vmax.xlane.f32.xlu1 %v381_v3  ;;  %v379_v5 = vsel %vm378_vm1, %v746_v63, -1e+30 }
 0x2b1   :  { %387 = vmax.xlane.f32.xlu0 %v379_v5  ;;  %v382_v6 = vsel %vm378_vm1, %v748_v1, -1e+30 }
 0x2b2   :  { %v380_v8 = vsel %vm378_vm1, %v752_v4, -1e+30 }
 0x2b4   :  { %393 = vmax.xlane.f32.xlu1 %v382_v6  ;;  %v595_v7 = vpop.f32.mrb[12].mxu0 }
 0x2b5   :  { %v361_v9 = vpop.f32.mrb[13].mxu0  ;;  %389 = vmax.xlane.f32.xlu0 %v380_v8  ;;  %v762_v13 = vadd.f32 %v595_v7, %v508_v59 }
 0x2b6   :  { %v760_v10 = vadd.f32 %v508_v59, %v361_v9  ;;  %v596_v11 = vpop.f32.mrb[14].mxu0 }
 0x2b7   :  { %v364_v12 = vpop.f32.mrb[15].mxu0  ;;  %v768_v16 = vadd.f32 %v596_v11, %v508_v59  ;;  %v385_v18 = vsel %vm378_vm1, %v762_v13, -1e+30 }
 0x2b8   :  { %v764_v14 = vadd.f32 %v508_v59, %v364_v12  ;;  %v383_v15 = vsel %vm378_vm1, %v760_v10, -1e+30 }
 0x2b9   :  { %395 = vmax.xlane.f32.xlu0 %v383_v15  ;;  %v386_v19 = vsel %vm378_vm1, %v768_v16, -1e+30 }
 0x2ba   :  { %v384_v17 = vsel %vm378_vm1, %v764_v14, -1e+30 }
 0x2bb   :  { %397 = vmax.xlane.f32.xlu1 %v384_v17 }
 0x2bd   :  { %399 = vmax.xlane.f32.xlu0 %v385_v18 }
 0x2bf   :  { %401 = vmax.xlane.f32.xlu1 %v386_v19 }
 0x33d   :  { %v776_v20 = vpop.xlane.xlu1 %391 }
 0x33e   :  { %v405_v21 = vsub.f32 %v381_v3, %v776_v20  ;;  %v779_v22 = vpop.xlane.xlu0 %387 }
 0x33f   :  { %v403_v23 = vsub.f32 %v379_v5, %v779_v22 }
 0x340   :  { %v415_v24 = vmul.f32 1.442695, %v405_v21 }
 0x341   :  { %v411_v25 = vmul.f32 1.442695, %v403_v23  ;;  %v782_v26 = vpop.xlane.xlu1 %393 }
 0x342   :  { %613 = vpow2.f32 %v415_v24  ;;  %v406_v27 = vsub.f32 %v382_v6, %v782_v26  ;;  %v785_v28 = vpop.xlane.xlu0 %389 }
 0x343   :  { %v404_v29 = vsub.f32 %v380_v8, %v785_v28  ;;  %615 = vpow2.f32 %v411_v25 }
 0x344   :  { %v417_v30 = vmul.f32 1.442695, %v406_v27 }
 0x345   :  { %v413_v31 = vmul.f32 1.442695, %v404_v29 }
 0x346   :  { %617 = vpow2.f32 %v417_v30  ;;  %v788_v32 = vpop.xlane.xlu0 %395 }
 0x347   :  { %v407_v33 = vsub.f32 %v383_v15, %v788_v32  ;;  %619 = vpow2.f32 %v413_v31 }
 0x348   :  { %v791_v34 = vpop.xlane.xlu1 %397 }
 0x349   :  { %v419_v35 = vmul.f32 1.442695, %v407_v33  ;;  %v408_v36 = vsub.f32 %v384_v17, %v791_v34 }
 0x34a   :  { %v794_v37 = vpop.xlane.xlu0 %399 }
 0x34b   :  { %621 = vpow2.f32 %v419_v35  ;;  %v421_v38 = vmul.f32 1.442695, %v408_v36  ;;  %v409_v39 = vsub.f32 %v385_v18, %v794_v37 }
 0x34c   :  { %v614_v40 = vpop.eup %613  ;;  %v797_v41 = vpop.xlane.xlu1 %401 }
 0x34d   :  { %623 = vpow2.f32 %v421_v38  ;;  %v423_v42 = vmul.f32 1.442695, %v409_v39  ;;  %v410_v43 = vsub.f32 %v386_v19, %v797_v41  ;;  %431 = vadd.xlane.f32.xlu0 %v614_v40  ;;  %v616_v44 = vpop.eup %615 }
 0x34f   :  { %625 = vpow2.f32 %v423_v42  ;;  %v425_v45 = vmul.f32 1.442695, %v410_v43 }
 0x350   :  { %v618_v46 = vpop.eup %617 }
 0x351   :  { %627 = vpow2.f32 %v425_v45  ;;  %433 = vadd.xlane.f32.xlu1 %v618_v46  ;;  %427 = vadd.xlane.f32.xlu0 %v616_v44  ;;  %v620_v47 = vpop.eup %619 }
 0x355   :  { %v622_v48 = vpop.eup %621  ;;  %429 = vadd.xlane.f32.xlu1 %v620_v47 }
 0x356   :  { %435 = vadd.xlane.f32.xlu0 %v622_v48 }
 0x357   :  { %v624_v49 = vpop.eup %623 }
 0x359   :  { %v626_v50 = vpop.eup %625  ;;  %437 = vadd.xlane.f32.xlu1 %v624_v49 }
 0x35a   :  { %439 = vadd.xlane.f32.xlu0 %v626_v50 }
 0x35b   :  { %v628_v51 = vpop.eup %627 }
 0x35d   :  { %441 = vadd.xlane.f32.xlu1 %v628_v51 }
 0x3da   :  { %v432_v52 = vpop.xlane.xlu0 %431 }
 0x3db   :  { %629 = vlog2.f32 %v432_v52 }
 0x3de   :  { %v434_v53 = vpop.xlane.xlu1 %433  ;;  %v428_v54 = vpop.xlane.xlu0 %427 }
 0x3df   :  { %631 = vlog2.f32 %v434_v53 }
 0x3e0   :  { %633 = vlog2.f32 %v428_v54 }
 0x3e2   :  { %v430_v55 = vpop.xlane.xlu1 %429 }
 0x3e3   :  { %635 = vlog2.f32 %v430_v55  ;;  %v436_v56 = vpop.xlane.xlu0 %435 }
 0x3e4   :  { %637 = vlog2.f32 %v436_v56 }
 0x3e5   :  { %v630_v57 = vpop.eup %629 }
 0x3e6   :  { %v448_v58 = vmul.f32 0.6931472, %v630_v57  ;;  %v438_v59 = vpop.xlane.xlu1 %437 }
 0x3e7   :  { %639 = vlog2.f32 %v438_v59  ;;  %v440_v60 = vpop.xlane.xlu0 %439 }
 0x3e8   :  { %v461_v62 = vadd.f32 %v448_v58, %v776_v20  ;;  %641 = vlog2.f32 %v440_v60 }
 0x3e9   :  { %v632_v0 = vpop.eup %631 }
 0x3ea   :  { %v634_v2 = vpop.eup %633  ;;  %v469_v3 = vsub.f32 %v744_v61, %v461_v62  ;;  %v450_v5 = vmul.f32 0.6931472, %v632_v0  ;;  %v442_v6 = vpop.xlane.xlu1 %441 }
 0x3eb   :  { %v444_v7 = vmul.f32 0.6931472, %v634_v2  ;;  %643 = vlog2.f32 %v442_v6 }
 0x3ec   :  { %477 = vst [vmem:[%s844_s4 + $0x10] sm:$0xff] %v469_v3  ;;  %v462_v8 = vadd.f32 %v450_v5, %v782_v26 }
 0x3ed   :  { %v636_v9 = vpop.eup %635  ;;  %v459_v11 = vadd.f32 %v444_v7, %v779_v22 }
 0x3ee   :  { %v638_v12 = vpop.eup %637  ;;  %v470_v15 = vsub.f32 %v748_v1, %v462_v8  ;;  %v446_v17 = vmul.f32 0.6931472, %v636_v9 }
 0x3ef   :  { %v467_v18 = vsub.f32 %v746_v63, %v459_v11  ;;  %v452_v61 = vmul.f32 0.6931472, %v638_v12 }
 0x3f0   :  { %478 = vst [vmem:[%s844_s4 + $0x18] sm:$0xff] %v470_v15  ;;  %v460_v19 = vadd.f32 %v446_v17, %v785_v28 }
 0x3f1   :  { %v640_v20 = vpop.eup %639  ;;  %475 = vst [vmem:[%s844_s4] sm:$0xff] %v467_v18  ;;  %v463_v21 = vadd.f32 %v452_v61, %v788_v32 }
 0x3f2   :  { %v642_v22 = vpop.eup %641  ;;  %v468_v1 = vsub.f32 %v752_v4, %v460_v19  ;;  %v454_v23 = vmul.f32 0.6931472, %v640_v20 }
 0x3f3   :  { %v471_v63 = vsub.f32 %v760_v10, %v463_v21  ;;  %v456_v24 = vmul.f32 0.6931472, %v642_v22 }
 0x3f4   :  { %476 = vst [vmem:[%s844_s4 + $0x8] sm:$0xff] %v468_v1  ;;  %v464_v25 = vadd.f32 %v454_v23, %v791_v34 }
 0x3f5   :  { %v644_v26 = vpop.eup %643  ;;  %479 = vst [vmem:[%s844_s4 + $0x20] sm:$0xff] %v471_v63  ;;  %v465_v27 = vadd.f32 %v456_v24, %v794_v37 }
 0x3f6   :  { %v472_v28 = vsub.f32 %v764_v14, %v464_v25  ;;  %v458_v4 = vmul.f32 0.6931472, %v644_v26 }
 0x3f7   :  { %v473_v29 = vsub.f32 %v762_v13, %v465_v27 }
 0x3f8   :  { %480 = vst [vmem:[%s844_s4 + $0x28] sm:$0xff] %v472_v28  ;;  %v466_v10 = vadd.f32 %v458_v4, %v797_v41 }
 0x3f9   :  { %481 = vst [vmem:[%s844_s4 + $0x30] sm:$0xff] %v473_v29 }
 0x3fa   :  { %v474_v30 = vsub.f32 %v768_v16, %v466_v10 }
 0x3fc   :  { %482 = vst [vmem:[%s844_s4 + $0x38] sm:$0xff] %v474_v30 }

</bundles_post_ra>
